<compile_context>
chip_gen: v7x
topology: tpu7x:2x2x1
jax: 0.10.0
libtpu: 0.0.40
codegen_flags: <defaults>
</compile_context>

<pallas_src>
import functools

import jax
import jax.numpy as jnp
from jax import lax
from jax.experimental import pallas as pl
from jax.experimental.pallas import tpu as pltpu

LANES = 128
SUBLANES = 8
CHUNK_ROWS = 512          # in-kernel accumulation chunk (512*128*4 = 256 KiB)
EPS = 1e-12


def _num_tensorcores() -> int:
    """How many TensorCores the leading 'parallel' grid axis can shard over."""
    try:
        kind = jax.devices()[0].device_kind.lower()
    except Exception:
        return 1
    # Megacore / multi-TC-per-device chips (v4, v5p, v7x).  v5e / v6e -> 1.
    if any(tag in kind for tag in ("v4", "v5p", "v7", "7x")):
        return 2
    return 1


def _mse_partial_kernel(x_ref, y_ref, o_ref, *, tile_rows, chunk, rows_valid,
                        tiles_per_core, mask_needed):
    """Accumulate lane-wise partial sums of (x - y)^2 into an (8,128) slot.

    x_ref / y_ref: (tile_rows, 128) input blocks for this (core, step).
    o_ref:         (1, 8, 128) per-core partial-sum block, revisited across
                   the trailing 'arbitrary' grid axis.
    """
    c = pl.program_id(0)   # core axis ("parallel")
    i = pl.program_id(1)   # row-tile reduction axis ("arbitrary")

    @pl.when(i == 0)
    def _():
        o_ref[0] = jnp.zeros((SUBLANES, LANES), jnp.float32)

    # Logical (unclamped) global start row of this tile.  For phantom tiles
    # (index_map clamps their data block) this is >= rows_valid, so the mask
    # below zeroes their contribution -> no double counting.
    start_row = (c * tiles_per_core + i) * tile_rows
    n_chunks = tile_rows // chunk

    def _tile_sum(masked):
        def body(j, acc):
            off = pl.multiple_of(j * chunk, chunk)
            xs = x_ref[pl.ds(off, chunk), :].astype(jnp.float32)
            ys = y_ref[pl.ds(off, chunk), :].astype(jnp.float32)
            d = xs - ys
            dd = d * d
            if masked:
                row = (lax.broadcasted_iota(jnp.int32, (chunk, 1), 0)
                       + start_row + off)
                dd = jnp.where(row < rows_valid, dd, 0.0)
            # (chunk,128) -> (chunk//8, 8, 128), sum leading axis: pure VPU
            # vreg adds, no cross-lane/sublane (XLU) work in the hot loop.
            return acc + jnp.sum(
                dd.reshape(chunk // SUBLANES, SUBLANES, LANES), axis=0)

        return lax.fori_loop(0, n_chunks, body,
                             jnp.zeros((SUBLANES, LANES), jnp.float32),
                             unroll=True)

    if mask_needed:
        ragged = start_row + tile_rows > rows_valid

        @pl.when(jnp.logical_not(ragged))
        def _():
            o_ref[0] += _tile_sum(False)

        @pl.when(ragged)
        def _():
            o_ref[0] += _tile_sum(True)
    else:
        o_ref[0] += _tile_sum(False)


def custom_mse_loss(x, y, *, tile_rows=4096):
    """Pallas equivalent of torch.mean((input - target) ** 2 + 1e-12)."""
    assert x.shape == y.shape, "input and target must have the same shape"
    n = x.size
    x_flat = x.reshape(-1)
    y_flat = y.reshape(-1)

    total = jnp.zeros((), jnp.float32)
    itemsize = jnp.dtype(x.dtype).itemsize

    rows = n // LANES                       # complete 128-lane rows
    bulk = rows * LANES if rows >= SUBLANES else 0

    if bulk > 0:
        if bulk == n:
            xb, yb = x_flat, y_flat         # copy-free reshape (common case)
        else:
            # TODO(synk): prefix slice may materialize a copy of the bulk when
            # n % 128 != 0; only the <128-element tail goes to the wrapper.
            xb, yb = x_flat[:bulk], y_flat[:bulk]
        x2 = xb.reshape(rows, LANES)
        y2 = yb.reshape(rows, LANES)

        # --- tile sizing: keep per-input block bytes ~2 MiB regardless of dtype
        t = tile_rows * max(1, 4 // itemsize)
        t = max(SUBLANES, (min(t, rows) // SUBLANES) * SUBLANES)
        if t >= CHUNK_ROWS:
            t = (t // CHUNK_ROWS) * CHUNK_ROWS
            chunk = CHUNK_ROWS
        else:
            chunk = t
        tile = t

        num_tiles = pl.cdiv(rows, tile)
        num_cores = _num_tensorcores()
        if num_tiles < num_cores:
            num_cores = 1
        tiles_per_core = pl.cdiv(num_tiles, num_cores)
        # Masking needed if the last tile is ragged or phantom tiles exist.
        mask_needed = (rows % tile != 0) or (num_tiles % num_cores != 0)

        def _in_map(c, i):
            g = c * tiles_per_core + i
            return (jnp.minimum(g, num_tiles - 1), 0)   # clamp phantom tiles

        kernel = functools.partial(
            _mse_partial_kernel,
            tile_rows=tile,
            chunk=chunk,
            rows_valid=rows,
            tiles_per_core=tiles_per_core,
            mask_needed=mask_needed,
        )

        block_bytes = tile * LANES * itemsize
        vmem_limit = int(min(48 << 20, max(32 << 20, 4 * block_bytes + (8 << 20))))

        partials = pl.pallas_call(
            kernel,
            out_shape=jax.ShapeDtypeStruct((num_cores, SUBLANES, LANES),
                                           jnp.float32),
            grid_spec=pltpu.PrefetchScalarGridSpec(
                num_scalar_prefetch=0,
                grid=(num_cores, tiles_per_core),
                in_specs=[
                    pl.BlockSpec((tile, LANES), _in_map),
                    pl.BlockSpec((tile, LANES), _in_map),
                ],
                out_specs=pl.BlockSpec((1, SUBLANES, LANES),
                                       lambda c, i: (c, 0, 0)),
            ),
            compiler_params=pltpu.CompilerParams(
                # core axis parallel (megacore sharding), reduction axis last
                dimension_semantics=("parallel", "arbitrary"),
                vmem_limit_bytes=vmem_limit,
            ),
            cost_estimate=pl.CostEstimate(
                flops=3 * rows * LANES,
                transcendentals=0,
                bytes_accessed=2 * rows * LANES * itemsize
                + num_cores * SUBLANES * LANES * 4,
            ),
        )(x2, y2)

        # Tiny final combine (<= 2*8*128 f32) outside the kernel.
        total = jnp.sum(partials)

    if bulk < n:
        # Sub-128-element tail (or whole array if n < 1024): plain jnp.
        tx = x_flat[bulk:].astype(jnp.float32)
        ty = y_flat[bulk:].astype(jnp.float32)
        d = tx - ty
        total = total + jnp.sum(d * d)

    return total / n + EPS


if __name__ == "__main__":
    key = jax.random.PRNGKey(0)
    k1, k2, k3, k4 = jax.random.split(key, 4)

    # Small NCHW-style shapes (module is shape-agnostic / elementwise)
    shape = (2, 4, 16, 16)
    x = jax.random.normal(k1, shape, dtype=jnp.float32)
    y = jax.random.normal(k2, shape, dtype=jnp.float32)

    loss = custom_mse_loss(x, y)
    jax.block_until_ready(loss)

    ref = jnp.mean((x - y) ** 2 + 1e-12)
    assert jnp.allclose(loss, ref, rtol=1e-6, atol=1e-6), (loss, ref)

    # Second check: ragged element count -> exercises multi-tile grid,
    # in-kernel last-tile mask, and the wrapper tail path (no jnp.pad).
    shape2 = (3, 5, 17, 19)
    x2 = jax.random.normal(k3, shape2, dtype=jnp.float32)
    y2 = jax.random.normal(k4, shape2, dtype=jnp.float32)
    loss2 = custom_mse_loss(x2, y2, tile_rows=16)
    jax.block_until_ready(loss2)
    ref2 = jnp.mean((x2 - y2) ** 2 + 1e-12)
    assert jnp.allclose(loss2, ref2, rtol=1e-6, atol=1e-6), (loss2, ref2)

    print("KERNEL_OK")
</pallas_src>

<mosaic_0001>
module attributes {stable_mosaic.version = 11 : i64} {
  func.func @_mse_partial_kernel(%arg0: i32, %arg1: i32, %arg2: memref<16x128xf32, #tpu.memory_space<vmem>>, %arg3: memref<16x128xf32, #tpu.memory_space<vmem>>, %arg4: memref<1x8x128xf32, #tpu.memory_space<vmem>>) attributes {dimension_semantics = [#tpu.dimension_semantics<parallel>, #tpu.dimension_semantics<arbitrary>], iteration_bounds = array<i64: 1, 1>, scalar_prefetch = 0 : i64, scratch_operands = 0 : i64, tpu.core_type = #tpu.core_type<tc>, window_params = [{transform_indices = @transform_0, window_bounds = array<i64: 16, 128>}, {transform_indices = @transform_1, window_bounds = array<i64: 16, 128>}, {transform_indices = @transform_2, window_bounds = array<i64: 1, 8, 128>}]} {
    %c0_i32 = arith.constant 0 : i32
    %0 = arith.cmpi eq, %arg1, %c0_i32 : i32
    %1 = arith.extui %0 : i1 to i32
    %c0_i32_0 = arith.constant 0 : i32
    %2 = arith.cmpi ne, %1, %c0_i32_0 : i32
    scf.if %2 {
      %cst_10 = arith.constant 0.000000e+00 : f32
      %21 = vector.broadcast %cst_10 : f32 to vector<8x128xf32>
      %c0_11 = arith.constant 0 : index
      %c0_12 = arith.constant 0 : index
      %c0_13 = arith.constant 0 : index
      %22 = vector.load %arg4[%c0_11, %c0_12, %c0_13] : memref<1x8x128xf32, #tpu.memory_space<vmem>>, vector<1x8x128xf32>
      %23 = vector.shape_cast %22 : vector<1x8x128xf32> to vector<8x128xf32>
      %24 = vector.shape_cast %21 : vector<8x128xf32> to vector<1x8x128xf32>
      tpu.vector_store %arg4[%c0_11, %c0_12, %c0_13], %24 {strides = array<i32>} : memref<1x8x128xf32, #tpu.memory_space<vmem>>, vector<1x8x128xf32>,
    } else {
    }
    %c0 = arith.constant 0 : index
    %c0_1 = arith.constant 0 : index
    %c0_2 = arith.constant 0 : index
    %3 = vector.load %arg4[%c0, %c0_1, %c0_2] : memref<1x8x128xf32, #tpu.memory_space<vmem>>, vector<1x8x128xf32>
    %4 = vector.shape_cast %3 : vector<1x8x128xf32> to vector<8x128xf32>
    %cst = arith.constant 0.000000e+00 : f32
    %5 = vector.broadcast %cst : f32 to vector<8x128xf32>
    %c0_i32_3 = arith.constant 0 : i32
    %c16_i32 = arith.constant 16 : i32
    %6 = arith.muli %c0_i32_3, %c16_i32 : i32
    %7 = tpu.assume_multiple %6, 16 : i32
    %8 = arith.index_cast %7 : i32 to index
    %c0_4 = arith.constant 0 : index
    %9 = vector.load %arg2[%8, %c0_4] : memref<16x128xf32, #tpu.memory_space<vmem>>, vector<16x128xf32>
    %10 = arith.index_cast %7 : i32 to index
    %c0_5 = arith.constant 0 : index
    %11 = vector.load %arg3[%10, %c0_5] : memref<16x128xf32, #tpu.memory_space<vmem>>, vector<16x128xf32>
    %12 = arith.subf %9, %11 : vector<16x128xf32>
    %13 = arith.mulf %12, %12 : vector<16x128xf32>
    %14 = vector.shape_cast %13 : vector<16x128xf32> to vector<2x8x128xf32>
    %cst_6 = arith.constant dense<0.000000e+00> : vector<8x128xf32>
    %15 = vector.multi_reduction <add>, %14, %cst_6 [0] : vector<2x8x128xf32> to vector<8x128xf32>
    %16 = arith.addf %5, %15 : vector<8x128xf32>
    %c1_i32 = arith.constant 1 : i32
    %17 = arith.addf %4, %16 : vector<8x128xf32>
    %c0_7 = arith.constant 0 : index
    %c0_8 = arith.constant 0 : index
    %c0_9 = arith.constant 0 : index
    %18 = vector.load %arg4[%c0_7, %c0_8, %c0_9] : memref<1x8x128xf32, #tpu.memory_space<vmem>>, vector<1x8x128xf32>
    %19 = vector.shape_cast %18 : vector<1x8x128xf32> to vector<8x128xf32>
    %20 = vector.shape_cast %17 : vector<8x128xf32> to vector<1x8x128xf32>
    tpu.vector_store %arg4[%c0_7, %c0_8, %c0_9], %20 {strides = array<i32>} : memref<1x8x128xf32, #tpu.memory_space<vmem>>, vector<1x8x128xf32>,
    return
  }
  func.func @transform_0(%arg0: i32, %arg1: i32) -> (i32, i32) {
    %c1_i32 = arith.constant 1 : i32
    %0 = arith.muli %arg0, %c1_i32 : i32
    %1 = arith.addi %0, %arg1 : i32
    %c0_i32 = arith.constant 0 : i32
    %2 = arith.minsi %1, %c0_i32 : i32
    %c0_i32_0 = arith.constant 0 : i32
    %c0_i32_1 = arith.constant 0 : i32
    return %2, %c0_i32_0 : i32, i32
  }
  func.func @transform_1(%arg0: i32, %arg1: i32) -> (i32, i32) {
    %c1_i32 = arith.constant 1 : i32
    %0 = arith.muli %arg0, %c1_i32 : i32
    %1 = arith.addi %0, %arg1 : i32
    %c0_i32 = arith.constant 0 : i32
    %2 = arith.minsi %1, %c0_i32 : i32
    %c0_i32_0 = arith.constant 0 : i32
    %c0_i32_1 = arith.constant 0 : i32
    return %2, %c0_i32_0 : i32, i32
  }
  func.func @transform_2(%arg0: i32, %arg1: i32) -> (i32, i32, i32) {
    %c0_i32 = arith.constant 0 : i32
    %c0_i32_0 = arith.constant 0 : i32
    %c0_i32_1 = arith.constant 0 : i32
    return %arg0, %c0_i32, %c0_i32_0 : i32, i32, i32
  }
}

</mosaic_0001>

<bundles_post_ra>
// kernel: tpu_custom_call.1
= control target key start
LH: loop header
LB: loop body
LE: loop exit
PB: predicated region body
PF: predicated region fallthrough
CT: control target
= control target key end

     0   :  { %7 = vsyncpa [#allocation3], 0  ;;  %s232_s0 = inlined_call_operand.hbm [shape: f32[16,128], index: 0, kind: input, shape index: {}]   ;;  %s233_s1 = inlined_call_operand.hbm [shape: f32[16,128], index: 1, kind: input, shape index: {}]   ;;  %s234_s2 = inlined_call_operand.hbm [shape: f32[1,8,128], index: 2, kind: output, shape index: {}]  }
   0x1   :  { %8 = vsyncpa [#allocation6], 0 }
   0x2   :  { %9 = vsyncpa [#allocation4], 0  ;;  %s176_s9 = smov [#allocation2]   ;;  %s104_s13 = scalar_lea.hbm %s232_s0, 256 }
   0x3   :  { %s21_s10 = sshll.u32 %s176_s9, 4  ;;  %p105_p0 = scmp.ne.s32.totalorder %s232_s0, %s104_s13  ;;  %s22_s10 = int_to_ptr.vmem [resolvable:$true] %s21_s10 }
   0x4   :  { %p108_p1 = scmp.lt.u32.totalorder %s104_s13, %s232_s0 }
   0x6   :  { %p110_p2 = pnand %p108_p1, %p105_p0 }
   0x8   :  { %113 = shalt.err (!%p110_p2)
}
   0x9   :  { %s114_s18 = scalar_lea.vmem %s22_s10, 256  ;;  %p119_p4 = scmp.lt.s32.totalorder %s22_s10, %s22_s10 }
   0xa   :  { %p115_p3 = scmp.ne.s32.totalorder %s22_s10, %s114_s18  ;;  %p120_p5 = scmp.lt.s32.totalorder %s114_s18, %s114_s18 }
   0xc   :  { %p121_p6 = por %p120_p5, %p119_p4 }
   0xe   :  { %p122_p7 = pnand %p121_p6, %p115_p3 }
  0x10   :  { %125 = shalt.err (!%p122_p7)
}
  0x11   :  { %s177_s19 = smov 128   ;;  %s178_s20 = smov 8  }
  0x12   :  { %27 = dma.hbm_to_vmem [thread:$0]  %s232_s0, 256, %s22_s10, [#allocation3], %s177_s19, %s177_s19, %s178_s20  }
  0x13   :  { %s179_s23 = smov [#allocation5]   ;;  %s126_s27 = scalar_lea.hbm %s233_s1, 256 }
  0x14   :  { %s39_s24 = sshll.u32 %s179_s23, 4  ;;  %p127_p8 = scmp.ne.s32.totalorder %s233_s1, %s126_s27  ;;  %s40_s24 = int_to_ptr.vmem [resolvable:$true] %s39_s24 }
  0x15   :  { %p130_p9 = scmp.lt.u32.totalorder %s126_s27, %s233_s1 }
  0x17   :  { %p132_p10 = pnand %p130_p9, %p127_p8 }
  0x19   :  { %135 = shalt.err (!%p132_p10)
}
  0x1a   :  { %s136_s4 = scalar_lea.vmem %s40_s24, 256  ;;  %p141_p12 = scmp.lt.s32.totalorder %s40_s24, %s40_s24 }
  0x1b   :  { %p137_p11 = scmp.ne.s32.totalorder %s40_s24, %s136_s4  ;;  %p142_p13 = scmp.lt.s32.totalorder %s136_s4, %s136_s4 }
  0x1d   :  { %p143_p0 = por %p142_p13, %p141_p12 }
  0x1f   :  { %p144_p1 = pnand %p143_p0, %p137_p11 }
  0x21   :  { %147 = shalt.err (!%p144_p1)
}
  0x22   :  { %45 = dma.hbm_to_vmem [thread:$0]  %s233_s1, 256, %s40_s24, [#allocation6], %s177_s19, %s177_s19, %s178_s20  }
  0x23   :  { %170 = dma.done.wait [#allocation3], 256  }
  0x24   :  { %171 = vsyncadd [#allocation3], 4294967040 }
  0x25   :  { %172 = dma.done.wait [#allocation6], 256  }
  0x26   :  { %173 = vsyncadd [#allocation6], 4294967040  ;;  %v66_v0 = vld [vmem:[#allocation2] sm:$0xff]  ;;  %v67_v1 = vld [vmem:[#allocation2 + $0x8] sm:$0xff]  ;;  %s180_s6 = smov [#allocation7]  }
  0x27   :  { %v68_v2 = vld [vmem:[#allocation5] sm:$0xff]  ;;  %v69_v3 = vld [vmem:[#allocation5 + $0x8] sm:$0xff]  ;;  %s84_s7 = sshll.u32 %s180_s6, 4  ;;  %s85_s7 = int_to_ptr.vmem [resolvable:$true] %s84_s7 }
  0x28   :  { %v70_v4 = vsub.f32 %v66_v0, %v68_v2  ;;  %v71_v5 = vsub.f32 %v67_v1, %v69_v3  ;;  %s148_s8 = scalar_lea.vmem %s85_s7, 128  ;;  %p153_p3 = scmp.lt.s32.totalorder %s85_s7, %s85_s7 }
  0x29   :  { %p149_p2 = scmp.ne.s32.totalorder %s85_s7, %s148_s8  ;;  %p154_p4 = scmp.lt.s32.totalorder %s148_s8, %s148_s8 }
  0x2a   :  { %v72_v6 = vmul.f32 %v70_v4, %v70_v4  ;;  %v73_v7 = vmul.f32 %v71_v5, %v71_v5 }
  0x2b   :  { %p155_p5 = por %p154_p4, %p153_p3 }
  0x2c   :  { %v74_v8 = vadd.f32 %v73_v7, %v72_v6 }
  0x2d   :  { %p156_p6 = pnand %p155_p5, %p149_p2 }
  0x2e   :  { %77 = vst [vmem:[#allocation7] sm:$0xff] %v74_v8 }
  0x2f   :  { %159 = shalt.err (!%p156_p6)
}
  0x30   :  { %s160_s10 = scalar_lea.hbm %s234_s2, 128 }
  0x31   :  { %p161_p7 = scmp.ne.s32.totalorder %s234_s2, %s160_s10  ;;  %p164_p8 = scmp.lt.u32.totalorder %s160_s10, %s234_s2 }
  0x33   :  { %p166_p9 = pnand %p164_p8, %p161_p7 }
  0x35   :  { %169 = shalt.err (!%p166_p9)
}
  0x36   :  { %87 = dma.vmem_to_hbm [thread:$0]  %s85_s7, 128, %s234_s2, [#allocation4]  }
  0x37   :  { %174 = dma.done.wait [#allocation4], 128  }
  0x38   :  { %175 = vsyncadd [#allocation4], 4294967168 }
  0x39   :  { %91 = vsyncpa [#allocation3], 1 }
  0x3a   :  { %92 = vsyncpa [#allocation6], 1 }
  0x3b   :  { %93 = vsyncpa [#allocation4], 1 }

</bundles_post_ra>
